<compile_context>
chip_gen: v7x
topology: tpu7x:2x2x1
jax: 0.10.0
libtpu: 0.0.40
codegen_flags: <defaults>
</compile_context>

<pallas_src>
import functools

import jax
import jax.numpy as jnp
import numpy as np
from jax.experimental import pallas as pl
from jax.experimental.pallas import tpu as pltpu

NUM_BRANCHES = 14
LANE = 128


def _mgnn14_kernel(a_ref, x_ref, w_ref, b_ref, lw_ref, lb_ref, out_ref, *,
                   num_branches, num_nodes, num_classes):
    """Single invocation: whole forward pass, everything resident in VMEM.

    a_ref  : (K*N, N)   bf16   stacked normalized adjacencies [A_1; ...; A_K] (natural layout)
    x_ref  : (N, F)     bf16   node features
    w_ref  : (K, F, H)  bf16   per-branch GCN weights
    b_ref  : (K, H)     f32    per-branch GCN biases
    lw_ref : (H, CP)    bf16   final linear weight, zero-padded to CP=128 lanes
    lb_ref : (1, CP)    f32    final linear bias, zero-padded
    out_ref: (N, CP)    f32    padded log-softmax output
    """
    # 1. Propagate-first: all K graph propagations as ONE well-shaped MXU matmul
    #    (sublane depth K*N; every MAC is useful).
    ax = jnp.dot(a_ref[...], x_ref[...], preferred_element_type=jnp.float32)   # (K*N, F) f32

    # 2. Per-branch feature transform + bias + ReLU, accumulated in f32
    #    (static unrolled loop; dropout = identity in eval).
    acc = None
    for k in range(num_branches):
        ax_k = ax[k * num_nodes:(k + 1) * num_nodes, :].astype(jnp.bfloat16)   # (N, F)
        h = jnp.dot(ax_k, w_ref[k], preferred_element_type=jnp.float32)        # (N, H)
        h = jnp.maximum(h + b_ref[k:k + 1, :], 0.0)
        acc = h if acc is None else acc + h
    # relu(sum of non-negatives) == identity -> dropped (semantics preserved).

    # 3. Final linear (padded to 128 output lanes) + lane-masked log-softmax (all f32 VPU/EUP).
    logits = jnp.dot(acc.astype(jnp.bfloat16), lw_ref[...],
                     preferred_element_type=jnp.float32) + lb_ref[...]         # (N, CP)
    lane = jax.lax.broadcasted_iota(jnp.int32, logits.shape, 1)
    valid = lane < num_classes
    logits = jnp.where(valid, logits, -1e30)                                   # mask pad lanes
    mx = jnp.max(logits, axis=-1, keepdims=True)
    ex = jnp.where(valid, jnp.exp(logits - mx), 0.0)
    lse = jnp.log(jnp.sum(ex, axis=-1, keepdims=True)) + mx
    out_ref[...] = (logits - lse).astype(out_ref.dtype)


def pack_params(a_hat_stack, gcn_w_stack, gcn_b_stack, lin_w, lin_b):
    """One-time parameter repacking (hoisted out of the forward path)."""
    K, N, _ = a_hat_stack.shape
    H = gcn_w_stack.shape[-1]
    C = lin_w.shape[-1]
    CP = max(LANE, pl.cdiv(C, LANE) * LANE)
    return {
        "a": a_hat_stack.reshape(K * N, N).astype(jnp.bfloat16),   # natural layout, free reshape
        "w": gcn_w_stack.astype(jnp.bfloat16),                     # (K, F, H)
        "b": gcn_b_stack.astype(jnp.float32),                      # (K, H)
        "lw": jnp.zeros((H, CP), jnp.bfloat16).at[:, :C].set(lin_w.astype(jnp.bfloat16)),
        "lb": jnp.zeros((1, CP), jnp.float32).at[0, :C].set(lin_b.astype(jnp.float32)),
    }


@functools.partial(jax.jit, static_argnames=("num_classes",))
def mgnn14_forward(packed, x, *, num_classes):
    a, w, b, lw, lb = packed["a"], packed["w"], packed["b"], packed["lw"], packed["lb"]
    KN, N = a.shape
    K = KN // N
    CP = lw.shape[-1]

    out_pad = pl.pallas_call(
        functools.partial(_mgnn14_kernel, num_branches=K, num_nodes=N,
                          num_classes=num_classes),
        out_shape=jax.ShapeDtypeStruct((N, CP), jnp.float32),
        in_specs=[pl.BlockSpec(memory_space=pltpu.MemorySpace.VMEM) for _ in range(6)],
        out_specs=pl.BlockSpec(memory_space=pltpu.MemorySpace.VMEM),
        compiler_params=pltpu.CompilerParams(vmem_limit_bytes=32 * 1024 * 1024),
    )(a, x.astype(jnp.bfloat16), w, b, lw, lb)
    return out_pad[:, :num_classes]


def dense_gcn_norm(edge_index, edge_weight, num_nodes):
    """Plain-JAX glue: densify GCNConv's normalized adjacency (self-loops + sym norm)."""
    src, dst = edge_index[0], edge_index[1]
    loop = jnp.arange(num_nodes, dtype=src.dtype)
    src = jnp.concatenate([src, loop])
    dst = jnp.concatenate([dst, loop])
    w = jnp.concatenate([edge_weight, jnp.ones((num_nodes,), edge_weight.dtype)])
    deg = jnp.zeros((num_nodes,), jnp.float32).at[dst].add(w)
    dinv = jnp.where(deg > 0, jax.lax.rsqrt(deg), 0.0)
    norm = dinv[src] * w * dinv[dst]
    # A_hat[i, j]: message from node j to node i
    return jnp.zeros((num_nodes, num_nodes), jnp.float32).at[dst, src].add(norm)


def reference_forward(a_hat_stack, gcn_w_stack, gcn_b_stack, x, lin_w, lin_b):
    """Pure-JAX reference mirroring the kernel's precision policy
    (bf16 MXU operands, f32 accumulation, f32 elementwise)."""
    K, N, _ = a_hat_stack.shape
    ax = jnp.dot(a_hat_stack.reshape(K * N, N).astype(jnp.bfloat16),
                 x.astype(jnp.bfloat16),
                 preferred_element_type=jnp.float32).reshape(K, N, -1)
    s = 0.0
    for k in range(K):
        h = jnp.dot(ax[k].astype(jnp.bfloat16), gcn_w_stack[k].astype(jnp.bfloat16),
                    preferred_element_type=jnp.float32) + gcn_b_stack[k]
        s = s + jnp.maximum(h, 0.0)
    logits = jnp.dot(s.astype(jnp.bfloat16), lin_w.astype(jnp.bfloat16),
                     preferred_element_type=jnp.float32) + lin_b
    return jax.nn.log_softmax(logits, axis=1)


if __name__ == "__main__":
    # Small shapes consistent with the module's forward (14 GCN branches).
    N = 32           # num nodes
    IN_CH = 16       # in_channels
    HID = 32         # hidden_channels (kept small; PyTorch default is 128)
    NUM_CLASSES = 8  # num_classes
    NUM_EDGES = 64   # edges per graph

    key = jax.random.PRNGKey(0)
    k_x, k_w, k_b, k_lw, k_lb, k_e, k_ew = jax.random.split(key, 7)

    x = jax.random.normal(k_x, (N, IN_CH), jnp.float32)

    # Deterministic parameter init (glorot-like for weights, zero / tiny biases).
    gcn_w_stack = (
        jax.random.normal(k_w, (NUM_BRANCHES, IN_CH, HID), jnp.float32)
        * (1.0 / np.sqrt(IN_CH))
    )
    gcn_b_stack = jnp.zeros((NUM_BRANCHES, HID), jnp.float32)
    lin_w = jax.random.normal(k_lw, (HID, NUM_CLASSES), jnp.float32) * (1.0 / np.sqrt(HID))
    lin_b = jax.random.normal(k_lb, (NUM_CLASSES,), jnp.float32) * 0.01

    # 14 random graphs (edge_index_k, w_k), densified to normalized adjacencies.
    edge_keys = jax.random.split(k_e, NUM_BRANCHES)
    weight_keys = jax.random.split(k_ew, NUM_BRANCHES)
    a_hats = []
    for kk in range(NUM_BRANCHES):
        ei = jax.random.randint(edge_keys[kk], (2, NUM_EDGES), 0, N, dtype=jnp.int32)
        ew = jax.random.uniform(weight_keys[kk], (NUM_EDGES,), jnp.float32, 0.1, 1.0)
        a_hats.append(dense_gcn_norm(ei, ew, N))
    a_hat_stack = jnp.stack(a_hats, axis=0)  # (14, N, N)

    # One-time packing (hoisted out of the forward path), then the Pallas forward.
    packed = jax.tree_util.tree_map(jax.block_until_ready,
                                    pack_params(a_hat_stack, gcn_w_stack, gcn_b_stack,
                                                lin_w, lin_b))
    out = mgnn14_forward(packed, x, num_classes=NUM_CLASSES)
    out = jax.block_until_ready(out)

    ref = reference_forward(a_hat_stack, gcn_w_stack, gcn_b_stack, x, lin_w, lin_b)
    np.testing.assert_allclose(np.asarray(out), np.asarray(ref), rtol=1e-3, atol=1e-3)

    print("KERNEL_OK")
</pallas_src>

<mosaic_0001>
module attributes {stable_mosaic.version = 11 : i64} {
  func.func @_mgnn14_kernel(%arg0: memref<448x32xbf16, #tpu.memory_space<vmem>>, %arg1: memref<32x16xbf16, #tpu.memory_space<vmem>>, %arg2: memref<14x16x32xbf16, #tpu.memory_space<vmem>>, %arg3: memref<14x32xf32, #tpu.memory_space<vmem>>, %arg4: memref<32x128xbf16, #tpu.memory_space<vmem>>, %arg5: memref<1x128xf32, #tpu.memory_space<vmem>>, %arg6: memref<32x128xf32, #tpu.memory_space<vmem>>) attributes {dimension_semantics = [], scalar_prefetch = 0 : i64, scratch_operands = 0 : i64, tpu.core_type = #tpu.core_type<tc>} {
    %c0 = arith.constant 0 : index
    %c0_0 = arith.constant 0 : index
    %0 = vector.load %arg0[%c0, %c0_0] : memref<448x32xbf16, #tpu.memory_space<vmem>>, vector<448x32xbf16>
    %c0_1 = arith.constant 0 : index
    %c0_2 = arith.constant 0 : index
    %1 = vector.load %arg1[%c0_1, %c0_2] : memref<32x16xbf16, #tpu.memory_space<vmem>>, vector<32x16xbf16>
    %cst = arith.constant dense<0.000000e+00> : vector<448x16xf32>
    %2 = tpu.matmul %0, %1, %cst {dimension_numbers = #tpu.dot_dimension_numbers<[1], [0], [0], [1], [0, 0, 1, 1], [], []>} : vector<448x32xbf16>, vector<32x16xbf16>, vector<448x16xf32> -> vector<448x16xf32>
    %3 = vector.extract_strided_slice %2 {offsets = [0, 0], sizes = [32, 16], strides = [1, 1]} : vector<448x16xf32> to vector<32x16xf32>
    %4 = arith.truncf %3 : vector<32x16xf32> to vector<32x16xbf16>
    %c0_3 = arith.constant 0 : index
    %c0_4 = arith.constant 0 : index
    %c0_5 = arith.constant 0 : index
    %5 = vector.load %arg2[%c0_3, %c0_4, %c0_5] : memref<14x16x32xbf16, #tpu.memory_space<vmem>>, vector<1x16x32xbf16>
    %6 = vector.shape_cast %5 : vector<1x16x32xbf16> to vector<16x32xbf16>
    %cst_6 = arith.constant dense<0.000000e+00> : vector<32x32xf32>
    %7 = tpu.matmul %4, %6, %cst_6 {dimension_numbers = #tpu.dot_dimension_numbers<[1], [0], [0], [1], [0, 0, 1, 1], [], []>} : vector<32x16xbf16>, vector<16x32xbf16>, vector<32x32xf32> -> vector<32x32xf32>
    %c0_7 = arith.constant 0 : index
    %c0_8 = arith.constant 0 : index
    %8 = vector.load %arg3[%c0_7, %c0_8] : memref<14x32xf32, #tpu.memory_space<vmem>>, vector<1x32xf32>
    %9 = vector.broadcast %8 : vector<1x32xf32> to vector<32x32xf32>
    %10 = arith.addf %7, %9 : vector<32x32xf32>
    %cst_9 = arith.constant 0.000000e+00 : f32
    %11 = vector.broadcast %cst_9 : f32 to vector<32x32xf32>
    %12 = arith.maximumf %10, %11 : vector<32x32xf32>
    %13 = vector.extract_strided_slice %2 {offsets = [32, 0], sizes = [32, 16], strides = [1, 1]} : vector<448x16xf32> to vector<32x16xf32>
    %14 = arith.truncf %13 : vector<32x16xf32> to vector<32x16xbf16>
    %c1 = arith.constant 1 : index
    %c0_10 = arith.constant 0 : index
    %c0_11 = arith.constant 0 : index
    %15 = vector.load %arg2[%c1, %c0_10, %c0_11] : memref<14x16x32xbf16, #tpu.memory_space<vmem>>, vector<1x16x32xbf16>
    %16 = vector.shape_cast %15 : vector<1x16x32xbf16> to vector<16x32xbf16>
    %cst_12 = arith.constant dense<0.000000e+00> : vector<32x32xf32>
    %17 = tpu.matmul %14, %16, %cst_12 {dimension_numbers = #tpu.dot_dimension_numbers<[1], [0], [0], [1], [0, 0, 1, 1], [], []>} : vector<32x16xbf16>, vector<16x32xbf16>, vector<32x32xf32> -> vector<32x32xf32>
    %c1_13 = arith.constant 1 : index
    %c0_14 = arith.constant 0 : index
    %18 = vector.load %arg3[%c1_13, %c0_14] : memref<14x32xf32, #tpu.memory_space<vmem>>, vector<1x32xf32>
    %19 = vector.broadcast %18 : vector<1x32xf32> to vector<32x32xf32>
    %20 = arith.addf %17, %19 : vector<32x32xf32>
    %cst_15 = arith.constant 0.000000e+00 : f32
    %21 = vector.broadcast %cst_15 : f32 to vector<32x32xf32>
    %22 = arith.maximumf %20, %21 : vector<32x32xf32>
    %23 = arith.addf %12, %22 : vector<32x32xf32>
    %24 = vector.extract_strided_slice %2 {offsets = [64, 0], sizes = [32, 16], strides = [1, 1]} : vector<448x16xf32> to vector<32x16xf32>
    %25 = arith.truncf %24 : vector<32x16xf32> to vector<32x16xbf16>
    %c2 = arith.constant 2 : index
    %c0_16 = arith.constant 0 : index
    %c0_17 = arith.constant 0 : index
    %26 = vector.load %arg2[%c2, %c0_16, %c0_17] : memref<14x16x32xbf16, #tpu.memory_space<vmem>>, vector<1x16x32xbf16>
    %27 = vector.shape_cast %26 : vector<1x16x32xbf16> to vector<16x32xbf16>
    %cst_18 = arith.constant dense<0.000000e+00> : vector<32x32xf32>
    %28 = tpu.matmul %25, %27, %cst_18 {dimension_numbers = #tpu.dot_dimension_numbers<[1], [0], [0], [1], [0, 0, 1, 1], [], []>} : vector<32x16xbf16>, vector<16x32xbf16>, vector<32x32xf32> -> vector<32x32xf32>
    %c2_19 = arith.constant 2 : index
    %c0_20 = arith.constant 0 : index
    %29 = vector.load %arg3[%c2_19, %c0_20] : memref<14x32xf32, #tpu.memory_space<vmem>>, vector<1x32xf32>
    %30 = vector.broadcast %29 : vector<1x32xf32> to vector<32x32xf32>
    %31 = arith.addf %28, %30 : vector<32x32xf32>
    %cst_21 = arith.constant 0.000000e+00 : f32
    %32 = vector.broadcast %cst_21 : f32 to vector<32x32xf32>
    %33 = arith.maximumf %31, %32 : vector<32x32xf32>
    %34 = arith.addf %23, %33 : vector<32x32xf32>
    %35 = vector.extract_strided_slice %2 {offsets = [96, 0], sizes = [32, 16], strides = [1, 1]} : vector<448x16xf32> to vector<32x16xf32>
    %36 = arith.truncf %35 : vector<32x16xf32> to vector<32x16xbf16>
    %c3 = arith.constant 3 : index
    %c0_22 = arith.constant 0 : index
    %c0_23 = arith.constant 0 : index
    %37 = vector.load %arg2[%c3, %c0_22, %c0_23] : memref<14x16x32xbf16, #tpu.memory_space<vmem>>, vector<1x16x32xbf16>
    %38 = vector.shape_cast %37 : vector<1x16x32xbf16> to vector<16x32xbf16>
    %cst_24 = arith.constant dense<0.000000e+00> : vector<32x32xf32>
    %39 = tpu.matmul %36, %38, %cst_24 {dimension_numbers = #tpu.dot_dimension_numbers<[1], [0], [0], [1], [0, 0, 1, 1], [], []>} : vector<32x16xbf16>, vector<16x32xbf16>, vector<32x32xf32> -> vector<32x32xf32>
    %c3_25 = arith.constant 3 : index
    %c0_26 = arith.constant 0 : index
    %40 = vector.load %arg3[%c3_25, %c0_26] : memref<14x32xf32, #tpu.memory_space<vmem>>, vector<1x32xf32>
    %41 = vector.broadcast %40 : vector<1x32xf32> to vector<32x32xf32>
    %42 = arith.addf %39, %41 : vector<32x32xf32>
    %cst_27 = arith.constant 0.000000e+00 : f32
    %43 = vector.broadcast %cst_27 : f32 to vector<32x32xf32>
    %44 = arith.maximumf %42, %43 : vector<32x32xf32>
    %45 = arith.addf %34, %44 : vector<32x32xf32>
    %46 = vector.extract_strided_slice %2 {offsets = [128, 0], sizes = [32, 16], strides = [1, 1]} : vector<448x16xf32> to vector<32x16xf32>
    %47 = arith.truncf %46 : vector<32x16xf32> to vector<32x16xbf16>
    %c4 = arith.constant 4 : index
    %c0_28 = arith.constant 0 : index
    %c0_29 = arith.constant 0 : index
    %48 = vector.load %arg2[%c4, %c0_28, %c0_29] : memref<14x16x32xbf16, #tpu.memory_space<vmem>>, vector<1x16x32xbf16>
    %49 = vector.shape_cast %48 : vector<1x16x32xbf16> to vector<16x32xbf16>
    %cst_30 = arith.constant dense<0.000000e+00> : vector<32x32xf32>
    %50 = tpu.matmul %47, %49, %cst_30 {dimension_numbers = #tpu.dot_dimension_numbers<[1], [0], [0], [1], [0, 0, 1, 1], [], []>} : vector<32x16xbf16>, vector<16x32xbf16>, vector<32x32xf32> -> vector<32x32xf32>
    %c4_31 = arith.constant 4 : index
    %c0_32 = arith.constant 0 : index
    %51 = vector.load %arg3[%c4_31, %c0_32] : memref<14x32xf32, #tpu.memory_space<vmem>>, vector<1x32xf32>
    %52 = vector.broadcast %51 : vector<1x32xf32> to vector<32x32xf32>
    %53 = arith.addf %50, %52 : vector<32x32xf32>
    %cst_33 = arith.constant 0.000000e+00 : f32
    %54 = vector.broadcast %cst_33 : f32 to vector<32x32xf32>
    %55 = arith.maximumf %53, %54 : vector<32x32xf32>
    %56 = arith.addf %45, %55 : vector<32x32xf32>
    %57 = vector.extract_strided_slice %2 {offsets = [160, 0], sizes = [32, 16], strides = [1, 1]} : vector<448x16xf32> to vector<32x16xf32>
    %58 = arith.truncf %57 : vector<32x16xf32> to vector<32x16xbf16>
    %c5 = arith.constant 5 : index
    %c0_34 = arith.constant 0 : index
    %c0_35 = arith.constant 0 : index
    %59 = vector.load %arg2[%c5, %c0_34, %c0_35] : memref<14x16x32xbf16, #tpu.memory_space<vmem>>, vector<1x16x32xbf16>
    %60 = vector.shape_cast %59 : vector<1x16x32xbf16> to vector<16x32xbf16>
    %cst_36 = arith.constant dense<0.000000e+00> : vector<32x32xf32>
    %61 = tpu.matmul %58, %60, %cst_36 {dimension_numbers = #tpu.dot_dimension_numbers<[1], [0], [0], [1], [0, 0, 1, 1], [], []>} : vector<32x16xbf16>, vector<16x32xbf16>, vector<32x32xf32> -> vector<32x32xf32>
    %c5_37 = arith.constant 5 : index
    %c0_38 = arith.constant 0 : index
    %62 = vector.load %arg3[%c5_37, %c0_38] : memref<14x32xf32, #tpu.memory_space<vmem>>, vector<1x32xf32>
    %63 = vector.broadcast %62 : vector<1x32xf32> to vector<32x32xf32>
    %64 = arith.addf %61, %63 : vector<32x32xf32>
    %cst_39 = arith.constant 0.000000e+00 : f32
    %65 = vector.broadcast %cst_39 : f32 to vector<32x32xf32>
    %66 = arith.maximumf %64, %65 : vector<32x32xf32>
    %67 = arith.addf %56, %66 : vector<32x32xf32>
    %68 = vector.extract_strided_slice %2 {offsets = [192, 0], sizes = [32, 16], strides = [1, 1]} : vector<448x16xf32> to vector<32x16xf32>
    %69 = arith.truncf %68 : vector<32x16xf32> to vector<32x16xbf16>
    %c6 = arith.constant 6 : index
    %c0_40 = arith.constant 0 : index
    %c0_41 = arith.constant 0 : index
    %70 = vector.load %arg2[%c6, %c0_40, %c0_41] : memref<14x16x32xbf16, #tpu.memory_space<vmem>>, vector<1x16x32xbf16>
    %71 = vector.shape_cast %70 : vector<1x16x32xbf16> to vector<16x32xbf16>
    %cst_42 = arith.constant dense<0.000000e+00> : vector<32x32xf32>
    %72 = tpu.matmul %69, %71, %cst_42 {dimension_numbers = #tpu.dot_dimension_numbers<[1], [0], [0], [1], [0, 0, 1, 1], [], []>} : vector<32x16xbf16>, vector<16x32xbf16>, vector<32x32xf32> -> vector<32x32xf32>
    %c6_43 = arith.constant 6 : index
    %c0_44 = arith.constant 0 : index
    %73 = vector.load %arg3[%c6_43, %c0_44] : memref<14x32xf32, #tpu.memory_space<vmem>>, vector<1x32xf32>
    %74 = vector.broadcast %73 : vector<1x32xf32> to vector<32x32xf32>
    %75 = arith.addf %72, %74 : vector<32x32xf32>
    %cst_45 = arith.constant 0.000000e+00 : f32
    %76 = vector.broadcast %cst_45 : f32 to vector<32x32xf32>
    %77 = arith.maximumf %75, %76 : vector<32x32xf32>
    %78 = arith.addf %67, %77 : vector<32x32xf32>
    %79 = vector.extract_strided_slice %2 {offsets = [224, 0], sizes = [32, 16], strides = [1, 1]} : vector<448x16xf32> to vector<32x16xf32>
    %80 = arith.truncf %79 : vector<32x16xf32> to vector<32x16xbf16>
    %c7 = arith.constant 7 : index
    %c0_46 = arith.constant 0 : index
    %c0_47 = arith.constant 0 : index
    %81 = vector.load %arg2[%c7, %c0_46, %c0_47] : memref<14x16x32xbf16, #tpu.memory_space<vmem>>, vector<1x16x32xbf16>
    %82 = vector.shape_cast %81 : vector<1x16x32xbf16> to vector<16x32xbf16>
    %cst_48 = arith.constant dense<0.000000e+00> : vector<32x32xf32>
    %83 = tpu.matmul %80, %82, %cst_48 {dimension_numbers = #tpu.dot_dimension_numbers<[1], [0], [0], [1], [0, 0, 1, 1], [], []>} : vector<32x16xbf16>, vector<16x32xbf16>, vector<32x32xf32> -> vector<32x32xf32>
    %c7_49 = arith.constant 7 : index
    %c0_50 = arith.constant 0 : index
    %84 = vector.load %arg3[%c7_49, %c0_50] : memref<14x32xf32, #tpu.memory_space<vmem>>, vector<1x32xf32>
    %85 = vector.broadcast %84 : vector<1x32xf32> to vector<32x32xf32>
    %86 = arith.addf %83, %85 : vector<32x32xf32>
    %cst_51 = arith.constant 0.000000e+00 : f32
    %87 = vector.broadcast %cst_51 : f32 to vector<32x32xf32>
    %88 = arith.maximumf %86, %87 : vector<32x32xf32>
    %89 = arith.addf %78, %88 : vector<32x32xf32>
    %90 = vector.extract_strided_slice %2 {offsets = [256, 0], sizes = [32, 16], strides = [1, 1]} : vector<448x16xf32> to vector<32x16xf32>
    %91 = arith.truncf %90 : vector<32x16xf32> to vector<32x16xbf16>
    %c8 = arith.constant 8 : index
    %c0_52 = arith.constant 0 : index
    %c0_53 = arith.constant 0 : index
    %92 = vector.load %arg2[%c8, %c0_52, %c0_53] : memref<14x16x32xbf16, #tpu.memory_space<vmem>>, vector<1x16x32xbf16>
    %93 = vector.shape_cast %92 : vector<1x16x32xbf16> to vector<16x32xbf16>
    %cst_54 = arith.constant dense<0.000000e+00> : vector<32x32xf32>
    %94 = tpu.matmul %91, %93, %cst_54 {dimension_numbers = #tpu.dot_dimension_numbers<[1], [0], [0], [1], [0, 0, 1, 1], [], []>} : vector<32x16xbf16>, vector<16x32xbf16>, vector<32x32xf32> -> vector<32x32xf32>
    %c8_55 = arith.constant 8 : index
    %c0_56 = arith.constant 0 : index
    %95 = vector.load %arg3[%c8_55, %c0_56] : memref<14x32xf32, #tpu.memory_space<vmem>>, vector<1x32xf32>
    %96 = vector.broadcast %95 : vector<1x32xf32> to vector<32x32xf32>
    %97 = arith.addf %94, %96 : vector<32x32xf32>
    %cst_57 = arith.constant 0.000000e+00 : f32
    %98 = vector.broadcast %cst_57 : f32 to vector<32x32xf32>
    %99 = arith.maximumf %97, %98 : vector<32x32xf32>
    %100 = arith.addf %89, %99 : vector<32x32xf32>
    %101 = vector.extract_strided_slice %2 {offsets = [288, 0], sizes = [32, 16], strides = [1, 1]} : vector<448x16xf32> to vector<32x16xf32>
    %102 = arith.truncf %101 : vector<32x16xf32> to vector<32x16xbf16>
    %c9 = arith.constant 9 : index
    %c0_58 = arith.constant 0 : index
    %c0_59 = arith.constant 0 : index
    %103 = vector.load %arg2[%c9, %c0_58, %c0_59] : memref<14x16x32xbf16, #tpu.memory_space<vmem>>, vector<1x16x32xbf16>
    %104 = vector.shape_cast %103 : vector<1x16x32xbf16> to vector<16x32xbf16>
    %cst_60 = arith.constant dense<0.000000e+00> : vector<32x32xf32>
    %105 = tpu.matmul %102, %104, %cst_60 {dimension_numbers = #tpu.dot_dimension_numbers<[1], [0], [0], [1], [0, 0, 1, 1], [], []>} : vector<32x16xbf16>, vector<16x32xbf16>, vector<32x32xf32> -> vector<32x32xf32>
    %c9_61 = arith.constant 9 : index
    %c0_62 = arith.constant 0 : index
    %106 = vector.load %arg3[%c9_61, %c0_62] : memref<14x32xf32, #tpu.memory_space<vmem>>, vector<1x32xf32>
    %107 = vector.broadcast %106 : vector<1x32xf32> to vector<32x32xf32>
    %108 = arith.addf %105, %107 : vector<32x32xf32>
    %cst_63 = arith.constant 0.000000e+00 : f32
    %109 = vector.broadcast %cst_63 : f32 to vector<32x32xf32>
    %110 = arith.maximumf %108, %109 : vector<32x32xf32>
    %111 = arith.addf %100, %110 : vector<32x32xf32>
    %112 = vector.extract_strided_slice %2 {offsets = [320, 0], sizes = [32, 16], strides = [1, 1]} : vector<448x16xf32> to vector<32x16xf32>
    %113 = arith.truncf %112 : vector<32x16xf32> to vector<32x16xbf16>
    %c10 = arith.constant 10 : index
    %c0_64 = arith.constant 0 : index
    %c0_65 = arith.constant 0 : index
    %114 = vector.load %arg2[%c10, %c0_64, %c0_65] : memref<14x16x32xbf16, #tpu.memory_space<vmem>>, vector<1x16x32xbf16>
    %115 = vector.shape_cast %114 : vector<1x16x32xbf16> to vector<16x32xbf16>
    %cst_66 = arith.constant dense<0.000000e+00> : vector<32x32xf32>
    %116 = tpu.matmul %113, %115, %cst_66 {dimension_numbers = #tpu.dot_dimension_numbers<[1], [0], [0], [1], [0, 0, 1, 1], [], []>} : vector<32x16xbf16>, vector<16x32xbf16>, vector<32x32xf32> -> vector<32x32xf32>
    %c10_67 = arith.constant 10 : index
    %c0_68 = arith.constant 0 : index
    %117 = vector.load %arg3[%c10_67, %c0_68] : memref<14x32xf32, #tpu.memory_space<vmem>>, vector<1x32xf32>
    %118 = vector.broadcast %117 : vector<1x32xf32> to vector<32x32xf32>
    %119 = arith.addf %116, %118 : vector<32x32xf32>
    %cst_69 = arith.constant 0.000000e+00 : f32
    %120 = vector.broadcast %cst_69 : f32 to vector<32x32xf32>
    %121 = arith.maximumf %119, %120 : vector<32x32xf32>
    %122 = arith.addf %111, %121 : vector<32x32xf32>
    %123 = vector.extract_strided_slice %2 {offsets = [352, 0], sizes = [32, 16], strides = [1, 1]} : vector<448x16xf32> to vector<32x16xf32>
    %124 = arith.truncf %123 : vector<32x16xf32> to vector<32x16xbf16>
    %c11 = arith.constant 11 : index
    %c0_70 = arith.constant 0 : index
    %c0_71 = arith.constant 0 : index
    %125 = vector.load %arg2[%c11, %c0_70, %c0_71] : memref<14x16x32xbf16, #tpu.memory_space<vmem>>, vector<1x16x32xbf16>
    %126 = vector.shape_cast %125 : vector<1x16x32xbf16> to vector<16x32xbf16>
    %cst_72 = arith.constant dense<0.000000e+00> : vector<32x32xf32>
    %127 = tpu.matmul %124, %126, %cst_72 {dimension_numbers = #tpu.dot_dimension_numbers<[1], [0], [0], [1], [0, 0, 1, 1], [], []>} : vector<32x16xbf16>, vector<16x32xbf16>, vector<32x32xf32> -> vector<32x32xf32>
    %c11_73 = arith.constant 11 : index
    %c0_74 = arith.constant 0 : index
    %128 = vector.load %arg3[%c11_73, %c0_74] : memref<14x32xf32, #tpu.memory_space<vmem>>, vector<1x32xf32>
    %129 = vector.broadcast %128 : vector<1x32xf32> to vector<32x32xf32>
    %130 = arith.addf %127, %129 : vector<32x32xf32>
    %cst_75 = arith.constant 0.000000e+00 : f32
    %131 = vector.broadcast %cst_75 : f32 to vector<32x32xf32>
    %132 = arith.maximumf %130, %131 : vector<32x32xf32>
    %133 = arith.addf %122, %132 : vector<32x32xf32>
    %134 = vector.extract_strided_slice %2 {offsets = [384, 0], sizes = [32, 16], strides = [1, 1]} : vector<448x16xf32> to vector<32x16xf32>
    %135 = arith.truncf %134 : vector<32x16xf32> to vector<32x16xbf16>
    %c12 = arith.constant 12 : index
    %c0_76 = arith.constant 0 : index
    %c0_77 = arith.constant 0 : index
    %136 = vector.load %arg2[%c12, %c0_76, %c0_77] : memref<14x16x32xbf16, #tpu.memory_space<vmem>>, vector<1x16x32xbf16>
    %137 = vector.shape_cast %136 : vector<1x16x32xbf16> to vector<16x32xbf16>
    %cst_78 = arith.constant dense<0.000000e+00> : vector<32x32xf32>
    %138 = tpu.matmul %135, %137, %cst_78 {dimension_numbers = #tpu.dot_dimension_numbers<[1], [0], [0], [1], [0, 0, 1, 1], [], []>} : vector<32x16xbf16>, vector<16x32xbf16>, vector<32x32xf32> -> vector<32x32xf32>
    %c12_79 = arith.constant 12 : index
    %c0_80 = arith.constant 0 : index
    %139 = vector.load %arg3[%c12_79, %c0_80] : memref<14x32xf32, #tpu.memory_space<vmem>>, vector<1x32xf32>
    %140 = vector.broadcast %139 : vector<1x32xf32> to vector<32x32xf32>
    %141 = arith.addf %138, %140 : vector<32x32xf32>
    %cst_81 = arith.constant 0.000000e+00 : f32
    %142 = vector.broadcast %cst_81 : f32 to vector<32x32xf32>
    %143 = arith.maximumf %141, %142 : vector<32x32xf32>
    %144 = arith.addf %133, %143 : vector<32x32xf32>
    %145 = vector.extract_strided_slice %2 {offsets = [416, 0], sizes = [32, 16], strides = [1, 1]} : vector<448x16xf32> to vector<32x16xf32>
    %146 = arith.truncf %145 : vector<32x16xf32> to vector<32x16xbf16>
    %c13 = arith.constant 13 : index
    %c0_82 = arith.constant 0 : index
    %c0_83 = arith.constant 0 : index
    %147 = vector.load %arg2[%c13, %c0_82, %c0_83] : memref<14x16x32xbf16, #tpu.memory_space<vmem>>, vector<1x16x32xbf16>
    %148 = vector.shape_cast %147 : vector<1x16x32xbf16> to vector<16x32xbf16>
    %cst_84 = arith.constant dense<0.000000e+00> : vector<32x32xf32>
    %149 = tpu.matmul %146, %148, %cst_84 {dimension_numbers = #tpu.dot_dimension_numbers<[1], [0], [0], [1], [0, 0, 1, 1], [], []>} : vector<32x16xbf16>, vector<16x32xbf16>, vector<32x32xf32> -> vector<32x32xf32>
    %c13_85 = arith.constant 13 : index
    %c0_86 = arith.constant 0 : index
    %150 = vector.load %arg3[%c13_85, %c0_86] : memref<14x32xf32, #tpu.memory_space<vmem>>, vector<1x32xf32>
    %151 = vector.broadcast %150 : vector<1x32xf32> to vector<32x32xf32>
    %152 = arith.addf %149, %151 : vector<32x32xf32>
    %cst_87 = arith.constant 0.000000e+00 : f32
    %153 = vector.broadcast %cst_87 : f32 to vector<32x32xf32>
    %154 = arith.maximumf %152, %153 : vector<32x32xf32>
    %155 = arith.addf %144, %154 : vector<32x32xf32>
    %156 = arith.truncf %155 : vector<32x32xf32> to vector<32x32xbf16>
    %c0_88 = arith.constant 0 : index
    %c0_89 = arith.constant 0 : index
    %157 = vector.load %arg4[%c0_88, %c0_89] : memref<32x128xbf16, #tpu.memory_space<vmem>>, vector<32x128xbf16>
    %cst_90 = arith.constant dense<0.000000e+00> : vector<32x128xf32>
    %158 = tpu.matmul %156, %157, %cst_90 {dimension_numbers = #tpu.dot_dimension_numbers<[1], [0], [0], [1], [0, 0, 1, 1], [], []>} : vector<32x32xbf16>, vector<32x128xbf16>, vector<32x128xf32> -> vector<32x128xf32>
    %c0_91 = arith.constant 0 : index
    %c0_92 = arith.constant 0 : index
    %159 = vector.load %arg5[%c0_91, %c0_92] : memref<1x128xf32, #tpu.memory_space<vmem>>, vector<1x128xf32>
    %160 = vector.broadcast %159 : vector<1x128xf32> to vector<32x128xf32>
    %161 = arith.addf %158, %160 : vector<32x128xf32>
    %162 = tpu.iota {dimensions = array<i32: 1>} : vector<32x128xi32>
    %c8_i32 = arith.constant 8 : i32
    %163 = vector.broadcast %c8_i32 : i32 to vector<32x128xi32>
    %164 = arith.cmpi slt, %162, %163 : vector<32x128xi32>
    %cst_93 = arith.constant -1.000000e+30 : f32
    %165 = vector.broadcast %cst_93 : f32 to vector<32x128xf32>
    %166 = arith.select %164, %161, %165 : vector<32x128xi1>, vector<32x128xf32>
    %cst_94 = arith.constant dense<0xFF800000> : vector<32xf32>
    %167 = vector.multi_reduction <maximumf>, %166, %cst_94 [1] : vector<32x128xf32> to vector<32xf32>
    %168 = vector.shape_cast %167 : vector<32xf32> to vector<32x1xf32>
    %169 = vector.broadcast %168 : vector<32x1xf32> to vector<32x128xf32>
    %170 = arith.subf %166, %169 : vector<32x128xf32>
    %171 = math.exp %170 : vector<32x128xf32>
    %cst_95 = arith.constant 0.000000e+00 : f32
    %172 = vector.broadcast %cst_95 : f32 to vector<32x128xf32>
    %173 = arith.select %164, %171, %172 : vector<32x128xi1>, vector<32x128xf32>
    %cst_96 = arith.constant dense<0.000000e+00> : vector<32xf32>
    %174 = vector.multi_reduction <add>, %173, %cst_96 [1] : vector<32x128xf32> to vector<32xf32>
    %175 = vector.shape_cast %174 : vector<32xf32> to vector<32x1xf32>
    %176 = math.log %175 : vector<32x1xf32>
    %177 = arith.addf %176, %168 : vector<32x1xf32>
    %178 = vector.broadcast %177 : vector<32x1xf32> to vector<32x128xf32>
    %179 = arith.subf %166, %178 : vector<32x128xf32>
    %c0_97 = arith.constant 0 : index
    %c0_98 = arith.constant 0 : index
    %180 = vector.load %arg6[%c0_97, %c0_98] : memref<32x128xf32, #tpu.memory_space<vmem>>, vector<32x128xf32>
    tpu.vector_store %arg6[%c0_97, %c0_98], %179 {strides = array<i32>} : memref<32x128xf32, #tpu.memory_space<vmem>>, vector<32x128xf32>,
    return
  }
}

</mosaic_0001>

<bundles_post_ra>
// kernel: mgnn14_forward.1
= control target key start
LH: loop header
LB: loop body
LE: loop exit
PB: predicated region body
PF: predicated region fallthrough
CT: control target
= control target key end

     0   :  { %vm236_vm0 = vcmask 261120   ;;  %vm593_vm1 = vcmask 130048   ;;  %s2559_s1 = inlined_call_operand.vmem [shape: bf16[32,16], index: 1, kind: input, shape index: {}]   ;;  %s2560_s0 = inlined_call_operand.vmem [shape: bf16[448,32], index: 0, kind: input, shape index: {}]   ;;  %s2561_s2 = inlined_call_operand.vmem [shape: bf16[14,16,32], index: 2, kind: input, shape index: {}]   ;;  %s2562_s4 = inlined_call_operand.vmem [shape: bf16[32,128], index: 4, kind: input, shape index: {}]   ;;  %s2563_s3 = inlined_call_operand.vmem [shape: f32[14,32], index: 3, kind: input, shape index: {}]   ;;  %s2564_s5 = inlined_call_operand.vmem [shape: f32[1,128], index: 5, kind: input, shape index: {}]   ;;  %s2565_s6 = inlined_call_operand.vmem [shape: f32[32,128], index: 6, kind: output, shape index: {}]  }
   0x1   :  { %v2196_v0 = vld [vmem:[%s2559_s1] sm:$0xff]   ;;  %v2197_v1 = vld [vmem:[%s2559_s1 + $0x8] sm:$0xff]   ;;  %v2200_v4 = vld [vmem:[%s2560_s0 + $0x10] sm:$0xff]  }
   0x2   :  { %2044 = vmatprep.subr.bf16.mxu0 %v2196_v0  ;;  %v2198_v2 = vld [vmem:[%s2560_s0] sm:$0xff]   ;;  %v2199_v3 = vld [vmem:[%s2560_s0 + $0x8] sm:$0xff]   ;;  %v2201_v5 = vld [vmem:[%s2560_s0 + $0x18] sm:$0xff]  }
   0x3   :  { %2045 = vmatpush3.bf16.msra.mxu0 %v2196_v0  ;;  %2048 = vmatprep.mubr.msk.bf16.mxu0 %vm236_vm0, %v2198_v2  ;;  %v2202_v6 = vld [vmem:[%s2560_s0 + $0x20] sm:$0xff]   ;;  %v2203_v7 = vld [vmem:[%s2560_s0 + $0x28] sm:$0xff]   ;;  %v2204_v8 = vld [vmem:[%s2560_s0 + $0x30] sm:$0xff]  }
   0x4   :  { %2046 = vmatprep.subr.bf16.mxu0 %v2197_v1  ;;  %v2205_v9 = vld [vmem:[%s2560_s0 + $0x38] sm:$0xff]   ;;  %v2206_v10 = vld [vmem:[%s2560_s0 + $0x40] sm:$0xff]   ;;  %v2207_v11 = vld [vmem:[%s2560_s0 + $0x48] sm:$0xff]  }
   0x5   :  { %v2208_v12 = vld [vmem:[%s2560_s0 + $0x50] sm:$0xff]   ;;  %v2209_v13 = vld [vmem:[%s2560_s0 + $0x58] sm:$0xff]   ;;  %v2210_v14 = vld [vmem:[%s2560_s0 + $0x60] sm:$0xff]  }
   0x6   :  { %v2211_v15 = vld [vmem:[%s2560_s0 + $0x68] sm:$0xff]   ;;  %v2212_v16 = vld [vmem:[%s2560_s0 + $0x70] sm:$0xff]   ;;  %v2213_v17 = vld [vmem:[%s2560_s0 + $0x78] sm:$0xff]  }
   0x7   :  { %2047 = vmatpush3.bf16.msra.mxu0 %v2197_v1  ;;  %v2214_v18 = vld [vmem:[%s2560_s0 + $0x80] sm:$0xff]   ;;  %v2215_v19 = vld [vmem:[%s2560_s0 + $0x88] sm:$0xff]   ;;  %v2216_v20 = vld [vmem:[%s2560_s0 + $0x90] sm:$0xff]  }
   0x8   :  { %v2217_v21 = vld [vmem:[%s2560_s0 + $0x98] sm:$0xff]   ;;  %v2218_v22 = vld [vmem:[%s2560_s0 + $0xa0] sm:$0xff]   ;;  %v2219_v23 = vld [vmem:[%s2560_s0 + $0xa8] sm:$0xff]  }
   0x9   :  { %v2220_v24 = vld [vmem:[%s2560_s0 + $0xb0] sm:$0xff]   ;;  %v2221_v25 = vld [vmem:[%s2560_s0 + $0xb8] sm:$0xff]   ;;  %v2222_v26 = vld [vmem:[%s2560_s0 + $0xc0] sm:$0xff]  }
   0xa   :  { %2049 = vmatmul.mubr.msk.bf16.vlgmr.msra.gmra.mrb[0].mxu0 %vm236_vm0, %v2199_v3  ;;  %v2226_v27 = vld [vmem:[%s2561_s2] sm:$0xff]   ;;  %v2227_v28 = vld [vmem:[%s2561_s2 + $0x8] sm:$0xff]   ;;  %v2224_v30 = vld [vmem:[%s2560_s0 + $0xd0] sm:$0xff]  }
   0xb   :  { %2052 = vmatprep.mubr.msk.bf16.mxu0 %vm236_vm0, %v2200_v4  ;;  %2104 = vmatprep.subr.bf16.mxu1 %v2226_v27  ;;  %v2223_v29 = vld [vmem:[%s2560_s0 + $0xc8] sm:$0xff]   ;;  %v2225_v31 = vld [vmem:[%s2560_s0 + $0xd8] sm:$0xff]   ;;  %v2228_v38 = vld [vmem:[%s2561_s2 + $0x10] sm:$0xff]  }
   0xc   :  { %2105 = vmatpush3.bf16.msra.mxu1 %v2226_v27  ;;  %v2229_v45 = vld [vmem:[%s2561_s2 + $0x18] sm:$0xff]   ;;  %v2230_v52 = vld [vmem:[%s2561_s2 + $0x20] sm:$0xff]   ;;  %v2231_v59 = vld [vmem:[%s2561_s2 + $0x28] sm:$0xff]  }
   0xd   :  { %2110 = vmatprep.subr.bf16.mxu1 %v2227_v28  ;;  %v2232_v2 = vld [vmem:[%s2561_s2 + $0x30] sm:$0xff]  }
  0x12   :  { %2053 = vmatmul.mubr.msk.bf16.gmra.mrb[4].mxu0 %vm236_vm0, %v2201_v5 }
  0x13   :  { %2056 = vmatprep.mubr.msk.bf16.mxu0 %vm236_vm0, %v2202_v6 }
  0x1a   :  { %2057 = vmatmul.mubr.msk.bf16.gmra.mrb[8].mxu0 %vm236_vm0, %v2203_v7 }
  0x1b   :  { %2060 = vmatprep.mubr.msk.bf16.mxu0 %vm236_vm0, %v2204_v8 }
  0x22   :  { %2061 = vmatmul.mubr.msk.bf16.gmra.mrb[12].mxu0 %vm236_vm0, %v2205_v9  ;;  %v2233_v9 = vld [vmem:[%s2561_s2 + $0x38] sm:$0xff]  }
  0x23   :  { %2064 = vmatprep.mubr.msk.bf16.mxu0 %vm236_vm0, %v2206_v10 }
  0x2a   :  { %2065 = vmatmul.mubr.msk.bf16.gmra.mrb[16].mxu0 %vm236_vm0, %v2207_v11 }
  0x2b   :  { %2068 = vmatprep.mubr.msk.bf16.mxu0 %vm236_vm0, %v2208_v12 }
  0x32   :  { %2069 = vmatmul.mubr.msk.bf16.gmra.mrb[20].mxu0 %vm236_vm0, %v2209_v13 }
  0x33   :  { %2072 = vmatprep.mubr.msk.bf16.mxu0 %vm236_vm0, %v2210_v14 }
  0x3a   :  { %2073 = vmatmul.mubr.msk.bf16.gmra.mrb[24].mxu0 %vm236_vm0, %v2211_v15 }
  0x3b   :  { %2076 = vmatprep.mubr.msk.bf16.mxu0 %vm236_vm0, %v2212_v16  ;;  %v2234_v16 = vld [vmem:[%s2561_s2 + $0x40] sm:$0xff]  }
  0x42   :  { %2077 = vmatmul.mubr.msk.bf16.gmra.mrb[28].mxu0 %vm236_vm0, %v2213_v17 }
  0x43   :  { %2080 = vmatprep.mubr.msk.bf16.mxu0 %vm236_vm0, %v2214_v18 }
  0x4a   :  { %2081 = vmatmul.mubr.msk.bf16.gmra.mrb[32].mxu0 %vm236_vm0, %v2215_v19 }
  0x4b   :  { %2084 = vmatprep.mubr.msk.bf16.mxu0 %vm236_vm0, %v2216_v20 }
  0x52   :  { %2085 = vmatmul.mubr.msk.bf16.gmra.mrb[36].mxu0 %vm236_vm0, %v2217_v21 }
  0x53   :  { %2088 = vmatprep.mubr.msk.bf16.mxu0 %vm236_vm0, %v2218_v22 }
  0x5a   :  { %2089 = vmatmul.mubr.msk.bf16.gmra.mrb[40].mxu0 %vm236_vm0, %v2219_v23  ;;  %v2235_v23 = vld [vmem:[%s2561_s2 + $0x48] sm:$0xff]  }
  0x5b   :  { %2092 = vmatprep.mubr.msk.bf16.mxu0 %vm236_vm0, %v2220_v24 }
  0x62   :  { %2093 = vmatmul.mubr.msk.bf16.gmra.mrb[44].mxu0 %vm236_vm0, %v2221_v25 }
  0x63   :  { %2096 = vmatprep.mubr.msk.bf16.mxu0 %vm236_vm0, %v2222_v26 }
  0x6a   :  { %2097 = vmatmul.mubr.msk.bf16.gmra.mrb[48].mxu0 %vm236_vm0, %v2223_v29 }
  0x6b   :  { %2100 = vmatprep.mubr.msk.bf16.mxu0 %vm236_vm0, %v2224_v30  ;;  %v2236_v30 = vld [vmem:[%s2561_s2 + $0x50] sm:$0xff]  }
  0x72   :  { %2101 = vmatmul.mubr.msk.bf16.gmra.mrb[52].mxu0 %vm236_vm0, %v2225_v31 }
  0xdd   :  { %v2050_v32 = vpop.f32.mrb[0].mxu0 }
  0xde   :  { %v355_v33 = vpop.f32.mrb[1].mxu0 }
  0xdf   :  { %v2051_v34 = vpop.f32.mrb[2].mxu0 }
  0xe0   :  { %v579_v35 = vpack.c.bf16 %v2051_v34, %v2050_v32  ;;  %v358_v36 = vpop.f32.mrb[3].mxu0 }
  0xe1   :  { %v578_v37 = vpack.c.bf16 %v358_v36, %v355_v33 }
  0xe3   :  { %2106 = vmatprep.mubr.msk.bf16.mxu1 %vm593_vm1, %v578_v37  ;;  %v2237_v37 = vld [vmem:[%s2561_s2 + $0x58] sm:$0xff]  }
  0xe4   :  { %2107 = vmatmul.mubr.msk.bf16.vlgmr.msra.gmra.mrb[0].mxu1 %vm593_vm1, %v579_v35 }
  0xe5   :  { %2111 = vmatpush3.bf16.msra.mxu1 %v2227_v28  ;;  %v2054_v39 = vpop.f32.mrb[4].mxu0 }
  0xe6   :  { %v371_v40 = vpop.f32.mrb[5].mxu0  ;;  %2116 = vmatprep.subr.bf16.mxu1 %v2228_v38 }
  0xe7   :  { %v2055_v41 = vpop.f32.mrb[6].mxu0 }
  0xe8   :  { %v654_v42 = vpack.c.bf16 %v2055_v41, %v2054_v39  ;;  %v374_v43 = vpop.f32.mrb[7].mxu0 }
  0xe9   :  { %v653_v44 = vpack.c.bf16 %v374_v43, %v371_v40 }
  0xeb   :  { %2112 = vmatprep.mubr.msk.bf16.mxu1 %vm593_vm1, %v653_v44  ;;  %v2238_v44 = vld [vmem:[%s2561_s2 + $0x60] sm:$0xff]  }
  0xec   :  { %2113 = vmatmul.mubr.msk.bf16.vlgmr.msra.gmra.mrb[4].mxu1 %vm593_vm1, %v654_v42 }
  0xed   :  { %2117 = vmatpush3.bf16.msra.mxu1 %v2228_v38  ;;  %v2058_v46 = vpop.f32.mrb[8].mxu0 }
  0xee   :  { %v387_v47 = vpop.f32.mrb[9].mxu0  ;;  %2122 = vmatprep.subr.bf16.mxu1 %v2229_v45 }
  0xef   :  { %v2059_v48 = vpop.f32.mrb[10].mxu0 }
  0xf0   :  { %v733_v49 = vpack.c.bf16 %v2059_v48, %v2058_v46  ;;  %v390_v50 = vpop.f32.mrb[11].mxu0 }
  0xf1   :  { %v732_v51 = vpack.c.bf16 %v390_v50, %v387_v47 }
  0xf3   :  { %2118 = vmatprep.mubr.msk.bf16.mxu1 %vm593_vm1, %v732_v51  ;;  %v2239_v51 = vld [vmem:[%s2561_s2 + $0x68] sm:$0xff]  }
  0xf4   :  { %2119 = vmatmul.mubr.msk.bf16.vlgmr.msra.gmra.mrb[8].mxu1 %vm593_vm1, %v733_v49 }
  0xf5   :  { %2123 = vmatpush3.bf16.msra.mxu1 %v2229_v45  ;;  %v2062_v53 = vpop.f32.mrb[12].mxu0 }
  0xf6   :  { %v403_v54 = vpop.f32.mrb[13].mxu0  ;;  %2128 = vmatprep.subr.bf16.mxu1 %v2230_v52 }
  0xf7   :  { %v2063_v55 = vpop.f32.mrb[14].mxu0 }
  0xf8   :  { %v812_v56 = vpack.c.bf16 %v2063_v55, %v2062_v53  ;;  %v406_v57 = vpop.f32.mrb[15].mxu0 }
  0xf9   :  { %v811_v58 = vpack.c.bf16 %v406_v57, %v403_v54 }
  0xfb   :  { %2124 = vmatprep.mubr.msk.bf16.mxu1 %vm593_vm1, %v811_v58 }
  0xfc   :  { %2125 = vmatmul.mubr.msk.bf16.vlgmr.msra.gmra.mrb[12].mxu1 %vm593_vm1, %v812_v56 }
  0xfd   :  { %2129 = vmatpush3.bf16.msra.mxu1 %v2230_v52  ;;  %v2066_v60 = vpop.f32.mrb[16].mxu0 }
  0xfe   :  { %v419_v61 = vpop.f32.mrb[17].mxu0  ;;  %2134 = vmatprep.subr.bf16.mxu1 %v2231_v59 }
  0xff   :  { %v2067_v62 = vpop.f32.mrb[18].mxu0 }
 0x100   :  { %v891_v63 = vpack.c.bf16 %v2067_v62, %v2066_v60  ;;  %v422_v0 = vpop.f32.mrb[19].mxu0 }
 0x101   :  { %v890_v1 = vpack.c.bf16 %v422_v0, %v419_v61  ;;  %v2240_v0 = vld [vmem:[%s2562_s4] sm:$0xff]  }
 0x103   :  { %2130 = vmatprep.mubr.msk.bf16.mxu1 %vm593_vm1, %v890_v1  ;;  %v2241_v1 = vld [vmem:[%s2562_s4 + $0x8] sm:$0xff]  }
 0x104   :  { %2131 = vmatmul.mubr.msk.bf16.vlgmr.msra.gmra.mrb[16].mxu1 %vm593_vm1, %v891_v63 }
 0x105   :  { %2135 = vmatpush3.bf16.msra.mxu1 %v2231_v59  ;;  %v2070_v3 = vpop.f32.mrb[20].mxu0 }
 0x106   :  { %v435_v4 = vpop.f32.mrb[21].mxu0  ;;  %2140 = vmatprep.subr.bf16.mxu1 %v2232_v2 }
 0x107   :  { %v2071_v5 = vpop.f32.mrb[22].mxu0 }
 0x108   :  { %v970_v6 = vpack.c.bf16 %v2071_v5, %v2070_v3  ;;  %v438_v7 = vpop.f32.mrb[23].mxu0 }
 0x109   :  { %v969_v8 = vpack.c.bf16 %v438_v7, %v435_v4  ;;  %v1887_v7 = vld [vmem:[%s2563_s3 + $0x1] ss:$0 sm:$0xff] }
 0x10b   :  { %2136 = vmatprep.mubr.msk.bf16.mxu1 %vm593_vm1, %v969_v8 }
 0x10c   :  { %2137 = vmatmul.mubr.msk.bf16.vlgmr.msra.gmra.mrb[20].mxu1 %vm593_vm1, %v970_v6  ;;  %v1881_v6 = vld [vmem:[%s2563_s3] ss:$0 sm:$0xff] }
 0x10d   :  { %2141 = vmatpush3.bf16.msra.mxu1 %v2232_v2  ;;  %v2074_v10 = vpop.f32.mrb[24].mxu0 }
 0x10e   :  { %v451_v11 = vpop.f32.mrb[25].mxu0  ;;  %2146 = vmatprep.subr.bf16.mxu1 %v2233_v9 }
 0x10f   :  { %v2075_v12 = vpop.f32.mrb[26].mxu0 }
 0x110   :  { %v1049_v13 = vpack.c.bf16 %v2075_v12, %v2074_v10  ;;  %v454_v14 = vpop.f32.mrb[27].mxu0 }
 0x111   :  { %v1048_v15 = vpack.c.bf16 %v454_v14, %v451_v11 }
 0x113   :  { %2142 = vmatprep.mubr.msk.bf16.mxu1 %vm593_vm1, %v1048_v15 }
 0x114   :  { %2143 = vmatmul.mubr.msk.bf16.vlgmr.msra.gmra.mrb[24].mxu1 %vm593_vm1, %v1049_v13 }
 0x115   :  { %2147 = vmatpush3.bf16.msra.mxu1 %v2233_v9  ;;  %v2078_v17 = vpop.f32.mrb[28].mxu0 }
 0x116   :  { %v467_v18 = vpop.f32.mrb[29].mxu0  ;;  %2152 = vmatprep.subr.bf16.mxu1 %v2234_v16 }
 0x117   :  { %v2079_v19 = vpop.f32.mrb[30].mxu0 }
 0x118   :  { %v1128_v20 = vpack.c.bf16 %v2079_v19, %v2078_v17  ;;  %v470_v21 = vpop.f32.mrb[31].mxu0 }
 0x119   :  { %v1127_v22 = vpack.c.bf16 %v470_v21, %v467_v18 }
 0x11b   :  { %2148 = vmatprep.mubr.msk.bf16.mxu1 %vm593_vm1, %v1127_v22 }
 0x11c   :  { %2149 = vmatmul.mubr.msk.bf16.vlgmr.msra.gmra.mrb[28].mxu1 %vm593_vm1, %v1128_v20 }
 0x11d   :  { %2153 = vmatpush3.bf16.msra.mxu1 %v2234_v16  ;;  %v2082_v24 = vpop.f32.mrb[32].mxu0 }
 0x11e   :  { %v483_v25 = vpop.f32.mrb[33].mxu0  ;;  %2158 = vmatprep.subr.bf16.mxu1 %v2235_v23 }
 0x11f   :  { %v2083_v26 = vpop.f32.mrb[34].mxu0 }
 0x120   :  { %v1207_v27 = vpack.c.bf16 %v2083_v26, %v2082_v24  ;;  %v486_v28 = vpop.f32.mrb[35].mxu0 }
 0x121   :  { %v1206_v29 = vpack.c.bf16 %v486_v28, %v483_v25 }
 0x123   :  { %2154 = vmatprep.mubr.msk.bf16.mxu1 %vm593_vm1, %v1206_v29 }
 0x124   :  { %2155 = vmatmul.mubr.msk.bf16.vlgmr.msra.gmra.mrb[32].mxu1 %vm593_vm1, %v1207_v27 }
 0x125   :  { %2159 = vmatpush3.bf16.msra.mxu1 %v2235_v23  ;;  %v2086_v31 = vpop.f32.mrb[36].mxu0 }
 0x126   :  { %v499_v32 = vpop.f32.mrb[37].mxu0  ;;  %2164 = vmatprep.subr.bf16.mxu1 %v2236_v30 }
 0x127   :  { %v2087_v33 = vpop.f32.mrb[38].mxu0 }
 0x128   :  { %v1286_v34 = vpack.c.bf16 %v2087_v33, %v2086_v31  ;;  %v502_v35 = vpop.f32.mrb[39].mxu0 }
 0x129   :  { %v1285_v36 = vpack.c.bf16 %v502_v35, %v499_v32 }
 0x12b   :  { %2160 = vmatprep.mubr.msk.bf16.mxu1 %vm593_vm1, %v1285_v36 }
 0x12c   :  { %2161 = vmatmul.mubr.msk.bf16.vlgmr.msra.gmra.mrb[36].mxu1 %vm593_vm1, %v1286_v34 }
 0x12d   :  { %2165 = vmatpush3.bf16.msra.mxu1 %v2236_v30  ;;  %v2090_v38 = vpop.f32.mrb[40].mxu0  ;;  %v1893_v30 = vld [vmem:[%s2563_s3 + $0x2] ss:$0 sm:$0xff] }
 0x12e   :  { %v515_v39 = vpop.f32.mrb[41].mxu0  ;;  %2170 = vmatprep.subr.bf16.mxu1 %v2237_v37 }
 0x12f   :  { %v2091_v40 = vpop.f32.mrb[42].mxu0 }
 0x130   :  { %v1365_v41 = vpack.c.bf16 %v2091_v40, %v2090_v38  ;;  %v518_v42 = vpop.f32.mrb[43].mxu0 }
 0x131   :  { %v1364_v43 = vpack.c.bf16 %v518_v42, %v515_v39 }
 0x133   :  { %2166 = vmatprep.mubr.msk.bf16.mxu1 %vm593_vm1, %v1364_v43 }
 0x134   :  { %2167 = vmatmul.mubr.msk.bf16.vlgmr.msra.gmra.mrb[40].mxu1 %vm593_vm1, %v1365_v41 }
 0x135   :  { %2171 = vmatpush3.bf16.msra.mxu1 %v2237_v37  ;;  %v2094_v45 = vpop.f32.mrb[44].mxu0 }
 0x136   :  { %v531_v46 = vpop.f32.mrb[45].mxu0  ;;  %2176 = vmatprep.subr.bf16.mxu1 %v2238_v44 }
 0x137   :  { %v2095_v47 = vpop.f32.mrb[46].mxu0 }
 0x138   :  { %v1444_v48 = vpack.c.bf16 %v2095_v47, %v2094_v45  ;;  %v534_v49 = vpop.f32.mrb[47].mxu0  ;;  %v1899_v47 = vld [vmem:[%s2563_s3 + $0x3] ss:$0 sm:$0xff] }
 0x139   :  { %v1443_v50 = vpack.c.bf16 %v534_v49, %v531_v46 }
 0x13b   :  { %2172 = vmatprep.mubr.msk.bf16.mxu1 %vm593_vm1, %v1443_v50 }
 0x13c   :  { %2173 = vmatmul.mubr.msk.bf16.vlgmr.msra.gmra.mrb[44].mxu1 %vm593_vm1, %v1444_v48 }
 0x13d   :  { %2177 = vmatpush3.bf16.msra.mxu1 %v2238_v44  ;;  %v2098_v52 = vpop.f32.mrb[48].mxu0 }
 0x13e   :  { %v547_v53 = vpop.f32.mrb[49].mxu0  ;;  %2182 = vmatprep.subr.bf16.mxu1 %v2239_v51 }
 0x13f   :  { %v2099_v54 = vpop.f32.mrb[50].mxu0 }
 0x140   :  { %v1523_v55 = vpack.c.bf16 %v2099_v54, %v2098_v52  ;;  %v550_v56 = vpop.f32.mrb[51].mxu0 }
 0x141   :  { %v1522_v57 = vpack.c.bf16 %v550_v56, %v547_v53 }
 0x143   :  { %2178 = vmatprep.mubr.msk.bf16.mxu1 %vm593_vm1, %v1522_v57 }
 0x144   :  { %2179 = vmatmul.mubr.msk.bf16.vlgmr.msra.gmra.mrb[48].mxu1 %vm593_vm1, %v1523_v55 }
 0x145   :  { %2183 = vmatpush3.bf16.msra.mxu1 %v2239_v51  ;;  %v2102_v58 = vpop.f32.mrb[52].mxu0 }
 0x146   :  { %v563_v59 = vpop.f32.mrb[53].mxu0  ;;  %2188 = vmatprep.subr.bf16.mxu1 %v2240_v0 }
 0x147   :  { %v2103_v60 = vpop.f32.mrb[54].mxu0 }
 0x148   :  { %v1602_v61 = vpack.c.bf16 %v2103_v60, %v2102_v58  ;;  %v566_v62 = vpop.f32.mrb[55].mxu0 }
 0x149   :  { %v1601_v63 = vpack.c.bf16 %v566_v62, %v563_v59 }
 0x14b   :  { %2184 = vmatprep.mubr.msk.bf16.mxu1 %vm593_vm1, %v1601_v63 }
 0x14c   :  { %2185 = vmatmul.mubr.msk.bf16.vlgmr.msra.gmra.mrb[52].mxu1 %vm593_vm1, %v1602_v61 }
 0x14d   :  { %2189 = vmatpush3.bf16.msra.mxu1 %v2240_v0  ;;  %v1905_v0 = vld [vmem:[%s2563_s3 + $0x4] ss:$0 sm:$0xff] }
 0x14e   :  { %2190 = vmatprep.subr.bf16.mxu1 %v2241_v1 }
 0x151   :  { %2191 = vmatpush3.bf16.msra.mxu1 %v2241_v1 }
 0x1b7   :  { %v2108_v2 = vpop.f32.mrb[0].mxu1 }
 0x1b8   :  { %v634_v3 = vpop.f32.mrb[1].mxu1  ;;  %v643_v8 = vadd.f32 %v2108_v2, %v1881_v6 }
 0x1b9   :  { %v2109_v4 = vpop.f32.mrb[2].mxu1  ;;  %v635_v9 = vadd.f32 %v1881_v6, %v634_v3 }
 0x1ba   :  { %v637_v5 = vpop.f32.mrb[3].mxu1  ;;  %v646_v11 = vadd.f32 %v2109_v4, %v1881_v6  ;;  %v651_v17 = vmax.f32 %v643_v8, 0.0 }
 0x1bb   :  { %v638_v14 = vadd.f32 %v1881_v6, %v637_v5  ;;  %v649_v21 = vmax.f32 %v635_v9, 0.0 }
 0x1bc   :  { %v652_v24 = vmax.f32 %v646_v11, 0.0 }
 0x1bd   :  { %v650_v27 = vmax.f32 %v638_v14, 0.0 }
 0x1bf   :  { %v2114_v10 = vpop.f32.mrb[4].mxu1 }
 0x1c0   :  { %v718_v12 = vadd.f32 %v2114_v10, %v1887_v7  ;;  %v709_v13 = vpop.f32.mrb[5].mxu1 }
 0x1c1   :  { %v710_v15 = vadd.f32 %v1887_v7, %v709_v13  ;;  %v2115_v16 = vpop.f32.mrb[6].mxu1 }
 0x1c2   :  { %v726_v18 = vmax.f32 %v718_v12, 0.0  ;;  %v721_v19 = vadd.f32 %v2115_v16, %v1887_v7  ;;  %v712_v20 = vpop.f32.mrb[7].mxu1 }
 0x1c3   :  { %v724_v22 = vmax.f32 %v710_v15, 0.0  ;;  %v713_v23 = vadd.f32 %v1887_v7, %v712_v20 }
 0x1c4   :  { %v730_v25 = vadd.f32 %v726_v18, %v651_v17  ;;  %v727_v26 = vmax.f32 %v721_v19, 0.0  ;;  %v1911_v17 = vld [vmem:[%s2563_s3 + $0x5] ss:$0 sm:$0xff] }
 0x1c5   :  { %v728_v28 = vadd.f32 %v724_v22, %v649_v21  ;;  %v725_v29 = vmax.f32 %v713_v23, 0.0 }
 0x1c6   :  { %v731_v31 = vadd.f32 %v727_v26, %v652_v24 }
 0x1c7   :  { %v729_v32 = vadd.f32 %v725_v29, %v650_v27  ;;  %v2120_v33 = vpop.f32.mrb[8].mxu1 }
 0x1c8   :  { %v797_v34 = vadd.f32 %v2120_v33, %v1893_v30  ;;  %v788_v35 = vpop.f32.mrb[9].mxu1 }
 0x1c9   :  { %v789_v36 = vadd.f32 %v1893_v30, %v788_v35  ;;  %v2121_v37 = vpop.f32.mrb[10].mxu1 }
 0x1ca   :  { %v805_v38 = vmax.f32 %v797_v34, 0.0  ;;  %v800_v39 = vadd.f32 %v2121_v37, %v1893_v30  ;;  %v791_v40 = vpop.f32.mrb[11].mxu1  ;;  %v1917_v34 = vld [vmem:[%s2563_s3 + $0x6] ss:$0 sm:$0xff] }
 0x1cb   :  { %v803_v41 = vmax.f32 %v789_v36, 0.0  ;;  %v792_v42 = vadd.f32 %v1893_v30, %v791_v40 }
 0x1cc   :  { %v809_v43 = vadd.f32 %v805_v38, %v730_v25  ;;  %v806_v44 = vmax.f32 %v800_v39, 0.0 }
 0x1cd   :  { %v807_v45 = vadd.f32 %v803_v41, %v728_v28  ;;  %v804_v46 = vmax.f32 %v792_v42, 0.0 }
 0x1ce   :  { %v810_v48 = vadd.f32 %v806_v44, %v731_v31 }
 0x1cf   :  { %v808_v49 = vadd.f32 %v804_v46, %v729_v32  ;;  %v2126_v50 = vpop.f32.mrb[12].mxu1 }
 0x1d0   :  { %v876_v51 = vadd.f32 %v2126_v50, %v1899_v47  ;;  %v867_v52 = vpop.f32.mrb[13].mxu1 }
 0x1d1   :  { %v868_v53 = vadd.f32 %v1899_v47, %v867_v52  ;;  %v2127_v54 = vpop.f32.mrb[14].mxu1 }
 0x1d2   :  { %v884_v55 = vmax.f32 %v876_v51, 0.0  ;;  %v879_v56 = vadd.f32 %v2127_v54, %v1899_v47  ;;  %v870_v57 = vpop.f32.mrb[15].mxu1  ;;  %v1923_v51 = vld [vmem:[%s2563_s3 + $0x7] ss:$0 sm:$0xff] }
 0x1d3   :  { %v882_v58 = vmax.f32 %v868_v53, 0.0  ;;  %v871_v59 = vadd.f32 %v1899_v47, %v870_v57 }
 0x1d4   :  { %v888_v60 = vadd.f32 %v884_v55, %v809_v43  ;;  %v885_v61 = vmax.f32 %v879_v56, 0.0 }
 0x1d5   :  { %v886_v62 = vadd.f32 %v882_v58, %v807_v45  ;;  %v883_v63 = vmax.f32 %v871_v59, 0.0 }
 0x1d6   :  { %v889_v1 = vadd.f32 %v885_v61, %v810_v48 }
 0x1d7   :  { %v887_v2 = vadd.f32 %v883_v63, %v808_v49  ;;  %v2132_v3 = vpop.f32.mrb[16].mxu1 }
 0x1d8   :  { %v955_v4 = vadd.f32 %v2132_v3, %v1905_v0  ;;  %v946_v5 = vpop.f32.mrb[17].mxu1 }
 0x1d9   :  { %v947_v6 = vadd.f32 %v1905_v0, %v946_v5  ;;  %v2133_v7 = vpop.f32.mrb[18].mxu1 }
 0x1da   :  { %v963_v8 = vmax.f32 %v955_v4, 0.0  ;;  %v958_v9 = vadd.f32 %v2133_v7, %v1905_v0  ;;  %v949_v10 = vpop.f32.mrb[19].mxu1  ;;  %v1929_v4 = vld [vmem:[%s2563_s3 + $0x8] ss:$0 sm:$0xff] }
 0x1db   :  { %v961_v11 = vmax.f32 %v947_v6, 0.0  ;;  %v950_v12 = vadd.f32 %v1905_v0, %v949_v10 }
 0x1dc   :  { %v967_v13 = vadd.f32 %v963_v8, %v888_v60  ;;  %v964_v14 = vmax.f32 %v958_v9, 0.0 }
 0x1dd   :  { %v965_v15 = vadd.f32 %v961_v11, %v886_v62  ;;  %v962_v16 = vmax.f32 %v950_v12, 0.0 }
 0x1de   :  { %v968_v18 = vadd.f32 %v964_v14, %v889_v1 }
 0x1df   :  { %v966_v19 = vadd.f32 %v962_v16, %v887_v2  ;;  %v2138_v20 = vpop.f32.mrb[20].mxu1 }
 0x1e0   :  { %v1034_v21 = vadd.f32 %v2138_v20, %v1911_v17  ;;  %v1025_v22 = vpop.f32.mrb[21].mxu1 }
 0x1e1   :  { %v1026_v23 = vadd.f32 %v1911_v17, %v1025_v22  ;;  %v2139_v24 = vpop.f32.mrb[22].mxu1 }
 0x1e2   :  { %v1042_v25 = vmax.f32 %v1034_v21, 0.0  ;;  %v1037_v26 = vadd.f32 %v2139_v24, %v1911_v17  ;;  %v1028_v27 = vpop.f32.mrb[23].mxu1  ;;  %v1935_v21 = vld [vmem:[%s2563_s3 + $0x9] ss:$0 sm:$0xff] }
 0x1e3   :  { %v1040_v28 = vmax.f32 %v1026_v23, 0.0  ;;  %v1029_v29 = vadd.f32 %v1911_v17, %v1028_v27 }
 0x1e4   :  { %v1046_v30 = vadd.f32 %v1042_v25, %v967_v13  ;;  %v1043_v31 = vmax.f32 %v1037_v26, 0.0 }
 0x1e5   :  { %v1044_v32 = vadd.f32 %v1040_v28, %v965_v15  ;;  %v1041_v33 = vmax.f32 %v1029_v29, 0.0 }
 0x1e6   :  { %v1047_v35 = vadd.f32 %v1043_v31, %v968_v18 }
 0x1e7   :  { %v1045_v36 = vadd.f32 %v1041_v33, %v966_v19  ;;  %v2144_v37 = vpop.f32.mrb[24].mxu1 }
 0x1e8   :  { %v1113_v38 = vadd.f32 %v2144_v37, %v1917_v34  ;;  %v1104_v39 = vpop.f32.mrb[25].mxu1 }
 0x1e9   :  { %v1105_v40 = vadd.f32 %v1917_v34, %v1104_v39  ;;  %v2145_v41 = vpop.f32.mrb[26].mxu1 }
 0x1ea   :  { %v1121_v42 = vmax.f32 %v1113_v38, 0.0  ;;  %v1116_v43 = vadd.f32 %v2145_v41, %v1917_v34  ;;  %v1107_v44 = vpop.f32.mrb[27].mxu1  ;;  %v1941_v38 = vld [vmem:[%s2563_s3 + $0xa] ss:$0 sm:$0xff] }
 0x1eb   :  { %v1119_v45 = vmax.f32 %v1105_v40, 0.0  ;;  %v1108_v46 = vadd.f32 %v1917_v34, %v1107_v44 }
 0x1ec   :  { %v1125_v47 = vadd.f32 %v1121_v42, %v1046_v30  ;;  %v1122_v48 = vmax.f32 %v1116_v43, 0.0 }
 0x1ed   :  { %v1123_v49 = vadd.f32 %v1119_v45, %v1044_v32  ;;  %v1120_v50 = vmax.f32 %v1108_v46, 0.0 }
 0x1ee   :  { %v1126_v52 = vadd.f32 %v1122_v48, %v1047_v35 }
 0x1ef   :  { %v1124_v53 = vadd.f32 %v1120_v50, %v1045_v36  ;;  %v2150_v54 = vpop.f32.mrb[28].mxu1 }
 0x1f0   :  { %v1192_v55 = vadd.f32 %v2150_v54, %v1923_v51  ;;  %v1183_v56 = vpop.f32.mrb[29].mxu1 }
 0x1f1   :  { %v1184_v57 = vadd.f32 %v1923_v51, %v1183_v56  ;;  %v2151_v58 = vpop.f32.mrb[30].mxu1 }
 0x1f2   :  { %v1200_v59 = vmax.f32 %v1192_v55, 0.0  ;;  %v1195_v60 = vadd.f32 %v2151_v58, %v1923_v51  ;;  %v1186_v61 = vpop.f32.mrb[31].mxu1  ;;  %v1947_v55 = vld [vmem:[%s2563_s3 + $0xb] ss:$0 sm:$0xff] }
 0x1f3   :  { %v1198_v62 = vmax.f32 %v1184_v57, 0.0  ;;  %v1187_v63 = vadd.f32 %v1923_v51, %v1186_v61 }
 0x1f4   :  { %v1204_v0 = vadd.f32 %v1200_v59, %v1125_v47  ;;  %v1201_v1 = vmax.f32 %v1195_v60, 0.0 }
 0x1f5   :  { %v1202_v2 = vadd.f32 %v1198_v62, %v1123_v49  ;;  %v1199_v3 = vmax.f32 %v1187_v63, 0.0 }
 0x1f6   :  { %v1205_v5 = vadd.f32 %v1201_v1, %v1126_v52 }
 0x1f7   :  { %v1203_v6 = vadd.f32 %v1199_v3, %v1124_v53  ;;  %v2156_v7 = vpop.f32.mrb[32].mxu1 }
 0x1f8   :  { %v1271_v8 = vadd.f32 %v2156_v7, %v1929_v4  ;;  %v1262_v9 = vpop.f32.mrb[33].mxu1 }
 0x1f9   :  { %v1263_v10 = vadd.f32 %v1929_v4, %v1262_v9  ;;  %v2157_v11 = vpop.f32.mrb[34].mxu1 }
 0x1fa   :  { %v1279_v12 = vmax.f32 %v1271_v8, 0.0  ;;  %v1274_v13 = vadd.f32 %v2157_v11, %v1929_v4  ;;  %v1265_v14 = vpop.f32.mrb[35].mxu1  ;;  %v1953_v8 = vld [vmem:[%s2563_s3 + $0xc] ss:$0 sm:$0xff] }
 0x1fb   :  { %v1277_v15 = vmax.f32 %v1263_v10, 0.0  ;;  %v1266_v16 = vadd.f32 %v1929_v4, %v1265_v14 }
 0x1fc   :  { %v1283_v17 = vadd.f32 %v1279_v12, %v1204_v0  ;;  %v1280_v18 = vmax.f32 %v1274_v13, 0.0 }
 0x1fd   :  { %v1281_v19 = vadd.f32 %v1277_v15, %v1202_v2  ;;  %v1278_v20 = vmax.f32 %v1266_v16, 0.0 }
 0x1fe   :  { %v1284_v22 = vadd.f32 %v1280_v18, %v1205_v5 }
 0x1ff   :  { %v1282_v23 = vadd.f32 %v1278_v20, %v1203_v6  ;;  %v2162_v24 = vpop.f32.mrb[36].mxu1 }
 0x200   :  { %v1350_v25 = vadd.f32 %v2162_v24, %v1935_v21  ;;  %v1341_v26 = vpop.f32.mrb[37].mxu1 }
 0x201   :  { %v1342_v27 = vadd.f32 %v1935_v21, %v1341_v26  ;;  %v2163_v28 = vpop.f32.mrb[38].mxu1 }
 0x202   :  { %v1358_v29 = vmax.f32 %v1350_v25, 0.0  ;;  %v1353_v30 = vadd.f32 %v2163_v28, %v1935_v21  ;;  %v1344_v31 = vpop.f32.mrb[39].mxu1  ;;  %v1959_v25 = vld [vmem:[%s2563_s3 + $0xd] ss:$0 sm:$0xff] }
 0x203   :  { %v1356_v32 = vmax.f32 %v1342_v27, 0.0  ;;  %v1345_v33 = vadd.f32 %v1935_v21, %v1344_v31 }
 0x204   :  { %v1362_v34 = vadd.f32 %v1358_v29, %v1283_v17  ;;  %v1359_v35 = vmax.f32 %v1353_v30, 0.0 }
 0x205   :  { %v1360_v36 = vadd.f32 %v1356_v32, %v1281_v19  ;;  %v1357_v37 = vmax.f32 %v1345_v33, 0.0 }
 0x206   :  { %v1363_v39 = vadd.f32 %v1359_v35, %v1284_v22 }
 0x207   :  { %v1361_v40 = vadd.f32 %v1357_v37, %v1282_v23  ;;  %v2168_v41 = vpop.f32.mrb[40].mxu1 }
 0x208   :  { %v1429_v42 = vadd.f32 %v2168_v41, %v1941_v38  ;;  %v1420_v43 = vpop.f32.mrb[41].mxu1 }
 0x209   :  { %v1421_v44 = vadd.f32 %v1941_v38, %v1420_v43  ;;  %v2169_v45 = vpop.f32.mrb[42].mxu1 }
 0x20a   :  { %v1437_v46 = vmax.f32 %v1429_v42, 0.0  ;;  %v1432_v47 = vadd.f32 %v2169_v45, %v1941_v38  ;;  %v1423_v48 = vpop.f32.mrb[43].mxu1 }
 0x20b   :  { %v1435_v49 = vmax.f32 %v1421_v44, 0.0  ;;  %v1424_v50 = vadd.f32 %v1941_v38, %v1423_v48  ;;  %v1963_v48 = vld [vmem:[%s2564_s5] ss:$0 sm:$0xff] }
 0x20c   :  { %v1441_v51 = vadd.f32 %v1437_v46, %v1362_v34  ;;  %v1438_v52 = vmax.f32 %v1432_v47, 0.0  ;;  %v1760_v46 = vlaneseq }
 0x20d   :  { %v1439_v53 = vadd.f32 %v1435_v49, %v1360_v36  ;;  %v1436_v54 = vmax.f32 %v1424_v50, 0.0 }
 0x20e   :  { %v1442_v56 = vadd.f32 %v1438_v52, %v1363_v39  ;;  %v1761_v47 = vand.u32 127, %v1760_v46 }
 0x20f   :  { %v1440_v57 = vadd.f32 %v1436_v54, %v1361_v40  ;;  %v2174_v58 = vpop.f32.mrb[44].mxu1 }
 0x210   :  { %v1508_v59 = vadd.f32 %v2174_v58, %v1947_v55  ;;  %v1499_v60 = vpop.f32.mrb[45].mxu1  ;;  %vm1762_vm2 = vcmp.lt.s32.totalorder %v1761_v47, 8 }
 0x211   :  { %v1500_v61 = vadd.f32 %v1947_v55, %v1499_v60  ;;  %v2175_v62 = vpop.f32.mrb[46].mxu1 }
 0x212   :  { %v1516_v63 = vmax.f32 %v1508_v59, 0.0  ;;  %v1511_v0 = vadd.f32 %v2175_v62, %v1947_v55  ;;  %v1502_v1 = vpop.f32.mrb[47].mxu1 }
 0x213   :  { %v1514_v2 = vmax.f32 %v1500_v61, 0.0  ;;  %v1503_v3 = vadd.f32 %v1947_v55, %v1502_v1 }
 0x214   :  { %v1520_v4 = vadd.f32 %v1516_v63, %v1441_v51  ;;  %v1517_v5 = vmax.f32 %v1511_v0, 0.0 }
 0x215   :  { %v1518_v6 = vadd.f32 %v1514_v2, %v1439_v53  ;;  %v1515_v7 = vmax.f32 %v1503_v3, 0.0 }
 0x216   :  { %v1521_v9 = vadd.f32 %v1517_v5, %v1442_v56 }
 0x217   :  { %v1519_v10 = vadd.f32 %v1515_v7, %v1440_v57  ;;  %v2180_v11 = vpop.f32.mrb[48].mxu1 }
 0x218   :  { %v1587_v12 = vadd.f32 %v2180_v11, %v1953_v8  ;;  %v1578_v13 = vpop.f32.mrb[49].mxu1 }
 0x219   :  { %v1579_v14 = vadd.f32 %v1953_v8, %v1578_v13  ;;  %v2181_v15 = vpop.f32.mrb[50].mxu1 }
 0x21a   :  { %v1595_v16 = vmax.f32 %v1587_v12, 0.0  ;;  %v1590_v17 = vadd.f32 %v2181_v15, %v1953_v8  ;;  %v1581_v18 = vpop.f32.mrb[51].mxu1 }
 0x21b   :  { %v1593_v19 = vmax.f32 %v1579_v14, 0.0  ;;  %v1582_v20 = vadd.f32 %v1953_v8, %v1581_v18 }
 0x21c   :  { %v1599_v21 = vadd.f32 %v1595_v16, %v1520_v4  ;;  %v1596_v22 = vmax.f32 %v1590_v17, 0.0 }
 0x21d   :  { %v1597_v23 = vadd.f32 %v1593_v19, %v1518_v6  ;;  %v1594_v24 = vmax.f32 %v1582_v20, 0.0 }
 0x21e   :  { %v1600_v26 = vadd.f32 %v1596_v22, %v1521_v9 }
 0x21f   :  { %v1598_v27 = vadd.f32 %v1594_v24, %v1519_v10  ;;  %v2186_v28 = vpop.f32.mrb[52].mxu1 }
 0x220   :  { %v1666_v29 = vadd.f32 %v2186_v28, %v1959_v25  ;;  %v1657_v30 = vpop.f32.mrb[53].mxu1 }
 0x221   :  { %v1658_v31 = vadd.f32 %v1959_v25, %v1657_v30  ;;  %v2187_v32 = vpop.f32.mrb[54].mxu1 }
 0x222   :  { %v1674_v33 = vmax.f32 %v1666_v29, 0.0  ;;  %v1669_v34 = vadd.f32 %v2187_v32, %v1959_v25  ;;  %v1660_v35 = vpop.f32.mrb[55].mxu1 }
 0x223   :  { %v1672_v36 = vmax.f32 %v1658_v31, 0.0  ;;  %v1661_v37 = vadd.f32 %v1959_v25, %v1660_v35 }
 0x224   :  { %v1678_v38 = vadd.f32 %v1674_v33, %v1599_v21  ;;  %v1675_v39 = vmax.f32 %v1669_v34, 0.0 }
 0x225   :  { %v1676_v40 = vadd.f32 %v1672_v36, %v1597_v23  ;;  %v1673_v41 = vmax.f32 %v1661_v37, 0.0 }
 0x226   :  { %v1679_v42 = vadd.f32 %v1675_v39, %v1600_v26 }
 0x227   :  { %v1677_v43 = vadd.f32 %v1673_v41, %v1598_v27 }
 0x228   :  { %v1681_v44 = vpack.c.bf16 %v1679_v42, %v1678_v38 }
 0x229   :  { %v1680_v45 = vpack.c.bf16 %v1677_v43, %v1676_v40 }
 0x22b   :  { %2192 = vmatprep.mubr.msk.bf16.mxu1 %vm236_vm0, %v1680_v45 }
 0x22c   :  { %2193 = vmatmul.mubr.msk.bf16.vlgmr.msra.gmra.mrb[56].mxu1 %vm236_vm0, %v1681_v44 }
 0x2ff   :  { %v2194_v49 = vpop.f32.mrb[56].mxu1 }
 0x300   :  { %v1754_v50 = vadd.f32 %v2194_v49, %v1963_v48  ;;  %v1745_v51 = vpop.f32.mrb[57].mxu1 }
 0x301   :  { %v1746_v52 = vadd.f32 %v1963_v48, %v1745_v51  ;;  %v2195_v53 = vpop.f32.mrb[58].mxu1 }
 0x302   :  { %v1757_v54 = vadd.f32 %v2195_v53, %v1963_v48  ;;  %v1748_v55 = vpop.f32.mrb[59].mxu1  ;;  %v2535_v56 = vsel %vm1762_vm2, %v1754_v50, -1e+30 }
 0x303   :  { %v1749_v57 = vadd.f32 %v1963_v48, %v1748_v55  ;;  %1771 = vmax.xlane.f32.xlu1 %v2535_v56  ;;  %v1763_v58 = vsel %vm1762_vm2, %v1746_v52, -1e+30 }
 0x304   :  { %1767 = vmax.xlane.f32.xlu0 %v1763_v58  ;;  %v1766_v59 = vsel %vm1762_vm2, %v1757_v54, -1e+30 }
 0x305   :  { %v1764_v60 = vsel %vm1762_vm2, %v1749_v57, -1e+30 }
 0x307   :  { %1773 = vmax.xlane.f32.xlu1 %v1766_v59 }
 0x308   :  { %1769 = vmax.xlane.f32.xlu0 %v1764_v60 }
 0x390   :  { %v1772_v61 = vpop.xlane.xlu1 %1771 }
 0x391   :  { %v1777_v62 = vsub.f32 %v2535_v56, %v1772_v61  ;;  %v1768_v63 = vpop.xlane.xlu0 %1767 }
 0x392   :  { %v1775_v0 = vsub.f32 %v1763_v58, %v1768_v63 }
 0x393   :  { %v1783_v1 = vmul.f32 1.442695, %v1777_v62 }
 0x394   :  { %v1779_v2 = vmul.f32 1.442695, %v1775_v0  ;;  %v1774_v3 = vpop.xlane.xlu1 %1773 }
 0x395   :  { %v1778_v4 = vsub.f32 %v1766_v59, %v1774_v3  ;;  %v1770_v5 = vpop.xlane.xlu0 %1769 }
 0x396   :  { %2242 = vpow2.f32 %v1779_v2  ;;  %v1776_v6 = vsub.f32 %v1764_v60, %v1770_v5 }
 0x397   :  { %2244 = vpow2.f32 %v1783_v1  ;;  %v1785_v7 = vmul.f32 1.442695, %v1778_v4 }
 0x398   :  { %v1781_v8 = vmul.f32 1.442695, %v1776_v6 }
 0x39a   :  { %2246 = vpow2.f32 %v1781_v8 }
 0x39b   :  { %2248 = vpow2.f32 %v1785_v7 }
 0x3a0   :  { %v2243_v9 = vpop.eup %2242 }
 0x3a1   :  { %v1787_v10 = vsel %vm1762_vm2, %v2243_v9, 0.0  ;;  %v2245_v11 = vpop.eup %2244 }
 0x3a2   :  { %1791 = vadd.xlane.f32.xlu0 %v1787_v10  ;;  %v1789_v13 = vsel %vm1762_vm2, %v2245_v11, 0.0 }
 0x3a4   :  { %v2247_v12 = vpop.eup %2246 }
 0x3a5   :  { %v1788_v14 = vsel %vm1762_vm2, %v2247_v12, 0.0  ;;  %v2249_v15 = vpop.eup %2248 }
 0x3a6   :  { %1795 = vadd.xlane.f32.xlu0 %v1789_v13  ;;  %1793 = vadd.xlane.f32.xlu1 %v1788_v14  ;;  %v1790_v16 = vsel %vm1762_vm2, %v2249_v15, 0.0 }
 0x3aa   :  { %1797 = vadd.xlane.f32.xlu1 %v1790_v16 }
 0x42f   :  { %v1792_v17 = vpop.xlane.xlu0 %1791 }
 0x430   :  { %2250 = vlog2.f32 %v1792_v17 }
 0x433   :  { %v1794_v18 = vpop.xlane.xlu1 %1793  ;;  %v1796_v19 = vpop.xlane.xlu0 %1795 }
 0x434   :  { %2252 = vlog2.f32 %v1794_v18 }
 0x435   :  { %2254 = vlog2.f32 %v1796_v19 }
 0x437   :  { %v1798_v20 = vpop.xlane.xlu1 %1797 }
 0x438   :  { %2256 = vlog2.f32 %v1798_v20 }
 0x43a   :  { %v2251_v21 = vpop.eup %2250 }
 0x43b   :  { %v1800_v22 = vmul.f32 0.6931472, %v2251_v21 }
 0x43d   :  { %v1807_v23 = vadd.f32 %v1800_v22, %v1768_v63 }
 0x43e   :  { %v2253_v24 = vpop.eup %2252 }
 0x43f   :  { %v2255_v25 = vpop.eup %2254  ;;  %v1811_v26 = vsub.f32 %v1763_v58, %v1807_v23  ;;  %v1802_v27 = vmul.f32 0.6931472, %v2253_v24 }
 0x440   :  { %v1804_v28 = vmul.f32 0.6931472, %v2255_v25 }
 0x441   :  { %1815 = vst [vmem:[%s2565_s6] sm:$0xff] %v1811_v26  ;;  %v1808_v29 = vadd.f32 %v1802_v27, %v1770_v5 }
 0x442   :  { %v2257_v30 = vpop.eup %2256  ;;  %v1809_v31 = vadd.f32 %v1804_v28, %v1772_v61 }
 0x443   :  { %v1812_v32 = vsub.f32 %v1764_v60, %v1808_v29  ;;  %v1806_v33 = vmul.f32 0.6931472, %v2257_v30 }
 0x444   :  { %v1813_v34 = vsub.f32 %v2535_v56, %v1809_v31 }
 0x445   :  { %1816 = vst [vmem:[%s2565_s6 + $0x8] sm:$0xff] %v1812_v32  ;;  %v1810_v35 = vadd.f32 %v1806_v33, %v1774_v3 }
 0x446   :  { %1817 = vst [vmem:[%s2565_s6 + $0x10] sm:$0xff] %v1813_v34 }
 0x447   :  { %v1814_v36 = vsub.f32 %v1766_v59, %v1810_v35 }
 0x449   :  { %1818 = vst [vmem:[%s2565_s6 + $0x18] sm:$0xff] %v1814_v36 }

</bundles_post_ra>
